<compile_context>
chip_gen: v7x
topology: tpu7x:2x2x1
jax: 0.10.0
libtpu: 0.0.40
codegen_flags: <defaults>
</compile_context>

<pallas_src>
import functools
import math

import jax
import jax.numpy as jnp
from jax.experimental import pallas as pl
from jax.experimental.pallas import tpu as pltpu


# ---------------------------------------------------------------------------
# Kernel 1: fused FFNLayerNorm (over channels) + Linear (over features)
#           for q, k and v — one batch per grid step, single launch.
# ---------------------------------------------------------------------------
def _qkv_ln_proj_kernel(q_ref, k_ref, v_ref, ln_ref, w_ref, b_ref,
                        qo_ref, ko_ref, vo_ref, *, eps, matmul_dtype):
    ln = ln_ref[...]                                   # (C, 6): wq|bq|wk|bk|wv|bv

    def ln_proj(x, w_t, bias, ln_w, ln_b):
        # FFNLayerNorm over the channel axis (axis 0 of this (C, F) tile).
        u = jnp.mean(x, axis=0, keepdims=True)         # (1, F)
        s = jnp.mean((x - u) ** 2, axis=0, keepdims=True)
        xn = (x - u) * jax.lax.rsqrt(s + eps)          # rsqrt -> EUP slot
        xn = ln_w * xn + ln_b                          # (C,1)*(C,F)+(C,1)
        # nn.Linear over the feature dim: y = xn @ W^T + b (W^T pre-transposed;
        # Wq^T already carries the 1/sqrt(head_dim) attention scale).
        y = jnp.dot(xn.astype(matmul_dtype), w_t.astype(matmul_dtype),
                    preferred_element_type=jnp.float32)
        return y + bias                                # (1, F) broadcast

    qo_ref[0] = ln_proj(q_ref[0], w_ref[0], b_ref[0], ln[:, 0:1], ln[:, 1:2])
    ko_ref[0] = ln_proj(k_ref[0], w_ref[1], b_ref[1], ln[:, 2:3], ln[:, 3:4])
    vo_ref[0] = ln_proj(v_ref[0], w_ref[2], b_ref[2], ln[:, 4:5], ln[:, 5:6])


def qkv_ln_projection(q, k, v, ln_qkv, w_qkv_t, b_qkv, *,
                      eps=1e-6, matmul_dtype=jnp.float32):
    B, C, F = q.shape
    kernel = functools.partial(_qkv_ln_proj_kernel, eps=eps,
                               matmul_dtype=matmul_dtype)
    act_spec = pl.BlockSpec((1, C, F), lambda b: (b, 0, 0))
    return pl.pallas_call(
        kernel,
        out_shape=tuple(jax.ShapeDtypeStruct((B, C, F), jnp.float32)
                        for _ in range(3)),
        grid=(B,),
        in_specs=[
            act_spec, act_spec, act_spec,
            pl.BlockSpec((C, 6), lambda b: (0, 0)),          # packed LN params
            pl.BlockSpec((3, F, F), lambda b: (0, 0, 0)),    # stacked W^T
            pl.BlockSpec((3, 1, F), lambda b: (0, 0, 0)),    # stacked biases
        ],
        out_specs=(act_spec, act_spec, act_spec),
        compiler_params=pltpu.CompilerParams(dimension_semantics=("parallel",)),
    )(q, k, v, ln_qkv, w_qkv_t, b_qkv)


# ---------------------------------------------------------------------------
# Kernel 2: per-batch attention over ALL heads with SoftmaxOne.
# Writes the merged (B, C, F) output directly (no transpose afterwards).
# ---------------------------------------------------------------------------
def _fused_mha_kernel(q_ref, k_ref, v_ref, o_ref, *rest,
                      num_heads, head_dim, matmul_dtype):
    w_ref = rest[0] if rest else None
    for h in range(num_heads):                       # static loop, H is small
        qh = q_ref[0, h]                             # (C, D), scale pre-folded
        kh = k_ref[0, h]                             # (C, D)
        vh = v_ref[0, h]                             # (C, D)
        scores = jax.lax.dot_general(
            qh.astype(matmul_dtype), kh.astype(matmul_dtype),
            (((1,), (1,)), ((), ())),
            preferred_element_type=jnp.float32)      # (C, C)
        # SoftmaxOne: exp(x - max) / (1 + sum exp(x - max)); all f32.
        m = jnp.max(scores, axis=-1, keepdims=True)
        e = jnp.exp(scores - m)
        attn_w = e * (1.0 / (1.0 + jnp.sum(e, axis=-1, keepdims=True)))
        out_h = jnp.dot(attn_w.astype(matmul_dtype), vh.astype(matmul_dtype),
                        preferred_element_type=jnp.float32)   # (C, D)
        # torch: attn.transpose(1,2).reshape(b,c,-1)  -> head h lands at
        # feature columns [h*D, (h+1)*D) of the merged output.
        o_ref[0, :, pl.ds(h * head_dim, head_dim)] = out_h
        if w_ref is not None:
            w_ref[0, h] = attn_w


def fused_mha(qh, kh, vh, *, return_weights=True, matmul_dtype=jnp.float32):
    B, H, C, D = qh.shape
    F = H * D
    kernel = functools.partial(_fused_mha_kernel, num_heads=H, head_dim=D,
                               matmul_dtype=matmul_dtype)
    in_spec = pl.BlockSpec((1, H, C, D), lambda b: (b, 0, 0, 0))
    out_shape = [jax.ShapeDtypeStruct((B, C, F), jnp.float32)]
    out_specs = [pl.BlockSpec((1, C, F), lambda b: (b, 0, 0))]
    if return_weights:
        out_shape.append(jax.ShapeDtypeStruct((B, H, C, C), jnp.float32))
        out_specs.append(pl.BlockSpec((1, H, C, C), lambda b: (b, 0, 0, 0)))
    outs = pl.pallas_call(
        kernel,
        out_shape=tuple(out_shape),
        grid=(B,),
        in_specs=[in_spec, in_spec, in_spec],
        out_specs=tuple(out_specs),
        compiler_params=pltpu.CompilerParams(dimension_semantics=("parallel",)),
    )(qh, kh, vh)
    if return_weights:
        return outs[0], outs[1]
    return outs[0], None


# ---------------------------------------------------------------------------
# Parameter packing (torch-like params -> kernel layout); folds 1/sqrt(D)
# into the q projection so the attention kernel needs no per-head scaling.
# ---------------------------------------------------------------------------
def pack_params(p, num_heads, feature_dim):
    d = feature_dim // num_heads
    scale = 1.0 / math.sqrt(d)
    ln_qkv = jnp.stack([p["ln_q_w"], p["ln_q_b"],
                        p["ln_k_w"], p["ln_k_b"],
                        p["ln_v_w"], p["ln_v_b"]], axis=1)          # (C, 6)
    w_qkv_t = jnp.stack([p["wq_t"] * scale, p["wk_t"], p["wv_t"]])  # (3, F, F)
    b_qkv = jnp.stack([p["bq"] * scale, p["bk"], p["bv"]]
                      ).reshape(3, 1, feature_dim)                  # (3, 1, F)
    return ln_qkv, w_qkv_t, b_qkv


# ---------------------------------------------------------------------------
# Full forward (MultiHeadSelfAttention.forward)
# ---------------------------------------------------------------------------
def multi_head_self_attention(q, k, v, params, num_heads, eps=1e-6,
                              return_weights=True, matmul_dtype=jnp.float32):
    assert q.shape == k.shape == v.shape
    b, c, f = q.shape
    assert f % num_heads == 0
    d = f // num_heads

    ln_qkv, w_qkv_t, b_qkv = pack_params(params, num_heads, f)
    qn, kn, vn = qkv_ln_projection(q, k, v, ln_qkv, w_qkv_t, b_qkv,
                                   eps=eps, matmul_dtype=matmul_dtype)

    # torch: .reshape(b, num_heads, c, f // num_heads) — pure row-major
    # reinterpretation of the contiguous buffer (free bitcast in XLA).
    qh = qn.reshape(b, num_heads, c, d)
    kh = kn.reshape(b, num_heads, c, d)
    vh = vn.reshape(b, num_heads, c, d)

    out, attn_w = fused_mha(qh, kh, vh, return_weights=return_weights,
                            matmul_dtype=matmul_dtype)
    return out, attn_w


# ---------------------------------------------------------------------------
# Plain-JAX reference (numerical parity check against the torch math)
# ---------------------------------------------------------------------------
def reference_forward(q, k, v, params, num_heads, eps=1e-6):
    def ln(x, w, bias):
        u = x.mean(axis=1, keepdims=True)
        s = ((x - u) ** 2).mean(axis=1, keepdims=True)
        xn = (x - u) / jnp.sqrt(s + eps)
        return w.reshape(1, -1, 1) * xn + bias.reshape(1, -1, 1)

    b, c, f = q.shape
    d = f // num_heads
    qn = ln(q, params["ln_q_w"], params["ln_q_b"]) @ params["wq_t"] + params["bq"]
    kn = ln(k, params["ln_k_w"], params["ln_k_b"]) @ params["wk_t"] + params["bk"]
    vn = ln(v, params["ln_v_w"], params["ln_v_b"]) @ params["wv_t"] + params["bv"]
    qh = qn.reshape(b, num_heads, c, d)
    kh = kn.reshape(b, num_heads, c, d)
    vh = vn.reshape(b, num_heads, c, d)
    scores = (qh / d ** 0.5) @ jnp.swapaxes(kh, -2, -1)
    m = scores.max(axis=-1, keepdims=True)
    e = jnp.exp(scores - m)
    w = e / (1.0 + e.sum(axis=-1, keepdims=True))
    out = (w @ vh).transpose(0, 2, 1, 3).reshape(b, c, f)
    return out, w


# ---------------------------------------------------------------------------
if __name__ == "__main__":
    B, C, F, H = 2, 8, 32, 4      # batch, hidden_channel (tokens), hidden_feature_dim, heads
    D = F // H
    keys = jax.random.split(jax.random.PRNGKey(0), 12)

    q = jax.random.normal(keys[0], (B, C, F), dtype=jnp.float32)
    k = jax.random.normal(keys[1], (B, C, F), dtype=jnp.float32)
    v = jax.random.normal(keys[2], (B, C, F), dtype=jnp.float32)

    xav = math.sqrt(6.0 / (F + F))
    params = {
        # FFNLayerNorm params (torch default init is ones/zeros; randomized a
        # bit here to exercise the affine path).
        "ln_q_w": 1.0 + 0.1 * jax.random.normal(keys[3], (C,), jnp.float32),
        "ln_q_b": 0.1 * jax.random.normal(keys[4], (C,), jnp.float32),
        "ln_k_w": 1.0 + 0.1 * jax.random.normal(keys[5], (C,), jnp.float32),
        "ln_k_b": 0.1 * jax.random.normal(keys[6], (C,), jnp.float32),
        "ln_v_w": 1.0 + 0.1 * jax.random.normal(keys[7], (C,), jnp.float32),
        "ln_v_b": 0.1 * jax.random.normal(keys[8], (C,), jnp.float32),
        # Linear weights stored pre-transposed (W^T), xavier-uniform-like.
        "wq_t": jax.random.uniform(keys[9], (F, F), jnp.float32, -xav, xav),
        "wk_t": jax.random.uniform(keys[10], (F, F), jnp.float32, -xav, xav),
        "wv_t": jax.random.uniform(keys[11], (F, F), jnp.float32, -xav, xav),
        "bq": 0.01 * jnp.arange(F, dtype=jnp.float32),
        "bk": jnp.zeros((F,), jnp.float32),
        "bv": 0.02 * jnp.ones((F,), jnp.float32),
    }

    # Full forward (f32 MXU path) + parity check against plain-JAX reference.
    out, attn_w = multi_head_self_attention(q, k, v, params, num_heads=H)
    out = jax.block_until_ready(out)
    attn_w = jax.block_until_ready(attn_w)

    ref_out, ref_w = reference_forward(q, k, v, params, num_heads=H)
    assert out.shape == (B, C, F) and attn_w.shape == (B, H, C, C)
    assert jnp.allclose(out, ref_out, atol=1e-4, rtol=1e-4)
    assert jnp.allclose(attn_w, ref_w, atol=1e-4, rtol=1e-4)

    # Attention-weights output is optional (drops the largest HBM write).
    out_only, none_w = multi_head_self_attention(
        q, k, v, params, num_heads=H, return_weights=False)
    out_only = jax.block_until_ready(out_only)
    assert none_w is None
    assert jnp.allclose(out_only, ref_out, atol=1e-4, rtol=1e-4)

    # Optional bf16 MXU operands (v6e/v7x), f32 accumulation + f32 softmax.
    out_bf16, _ = multi_head_self_attention(
        q, k, v, params, num_heads=H, matmul_dtype=jnp.bfloat16)
    out_bf16 = jax.block_until_ready(out_bf16)
    assert jnp.allclose(out_bf16, ref_out, atol=0.25, rtol=0.0)

    print("KERNEL_OK")
</pallas_src>

<mosaic_0001>
module attributes {stable_mosaic.version = 11 : i64} {
  func.func @_qkv_ln_proj_kernel(%arg0: i32, %arg1: memref<1x8x32xf32, #tpu.memory_space<vmem>>, %arg2: memref<1x8x32xf32, #tpu.memory_space<vmem>>, %arg3: memref<1x8x32xf32, #tpu.memory_space<vmem>>, %arg4: memref<8x6xf32, #tpu.memory_space<vmem>>, %arg5: memref<3x32x32xf32, #tpu.memory_space<vmem>>, %arg6: memref<3x1x32xf32, #tpu.memory_space<vmem>>, %arg7: memref<1x8x32xf32, #tpu.memory_space<vmem>>, %arg8: memref<1x8x32xf32, #tpu.memory_space<vmem>>, %arg9: memref<1x8x32xf32, #tpu.memory_space<vmem>>) attributes {dimension_semantics = [#tpu.dimension_semantics<parallel>], iteration_bounds = array<i64: 2>, scalar_prefetch = 0 : i64, scratch_operands = 0 : i64, tpu.core_type = #tpu.core_type<tc>, window_params = [{transform_indices = @transform_0, window_bounds = array<i64: 1, 8, 32>}, {transform_indices = @transform_1, window_bounds = array<i64: 1, 8, 32>}, {transform_indices = @transform_2, window_bounds = array<i64: 1, 8, 32>}, {pipeline_mode = #tpu.pipeline_mode<synchronous>, transform_indices = @transform_3, window_bounds = array<i64: 8, 6>}, {pipeline_mode = #tpu.pipeline_mode<synchronous>, transform_indices = @transform_4, window_bounds = array<i64: 3, 32, 32>}, {pipeline_mode = #tpu.pipeline_mode<synchronous>, transform_indices = @transform_5, window_bounds = array<i64: 3, 1, 32>}, {transform_indices = @transform_6, window_bounds = array<i64: 1, 8, 32>}, {transform_indices = @transform_7, window_bounds = array<i64: 1, 8, 32>}, {transform_indices = @transform_8, window_bounds = array<i64: 1, 8, 32>}]} {
    %c0 = arith.constant 0 : index
    %c0_0 = arith.constant 0 : index
    %0 = vector.load %arg4[%c0, %c0_0] : memref<8x6xf32, #tpu.memory_space<vmem>>, vector<8x6xf32>
    %c0_1 = arith.constant 0 : index
    %c0_2 = arith.constant 0 : index
    %c0_3 = arith.constant 0 : index
    %1 = vector.load %arg1[%c0_1, %c0_2, %c0_3] : memref<1x8x32xf32, #tpu.memory_space<vmem>>, vector<1x8x32xf32>
    %2 = vector.shape_cast %1 : vector<1x8x32xf32> to vector<8x32xf32>
    %c0_4 = arith.constant 0 : index
    %c0_5 = arith.constant 0 : index
    %c0_6 = arith.constant 0 : index
    %3 = vector.load %arg5[%c0_4, %c0_5, %c0_6] : memref<3x32x32xf32, #tpu.memory_space<vmem>>, vector<1x32x32xf32>
    %4 = vector.shape_cast %3 : vector<1x32x32xf32> to vector<32x32xf32>
    %c0_7 = arith.constant 0 : index
    %c0_8 = arith.constant 0 : index
    %c0_9 = arith.constant 0 : index
    %5 = vector.load %arg6[%c0_7, %c0_8, %c0_9] : memref<3x1x32xf32, #tpu.memory_space<vmem>>, vector<1x1x32xf32>
    %6 = vector.shape_cast %5 : vector<1x1x32xf32> to vector<1x32xf32>
    %7 = vector.extract_strided_slice %0 {offsets = [0, 0], sizes = [8, 1], strides = [1, 1]} : vector<8x6xf32> to vector<8x1xf32>
    %8 = vector.extract_strided_slice %0 {offsets = [0, 1], sizes = [8, 1], strides = [1, 1]} : vector<8x6xf32> to vector<8x1xf32>
    %cst = arith.constant dense<0.000000e+00> : vector<32xf32>
    %9 = vector.multi_reduction <add>, %2, %cst [0] : vector<8x32xf32> to vector<32xf32>
    %10 = vector.shape_cast %9 : vector<32xf32> to vector<1x32xf32>
    %cst_10 = arith.constant 8.000000e+00 : f32
    %11 = vector.broadcast %cst_10 : f32 to vector<1x32xf32>
    %12 = arith.divf %10, %11 : vector<1x32xf32>
    %13 = vector.broadcast %12 : vector<1x32xf32> to vector<8x32xf32>
    %14 = arith.subf %2, %13 : vector<8x32xf32>
    %15 = arith.mulf %14, %14 : vector<8x32xf32>
    %cst_11 = arith.constant dense<0.000000e+00> : vector<32xf32>
    %16 = vector.multi_reduction <add>, %15, %cst_11 [0] : vector<8x32xf32> to vector<32xf32>
    %17 = vector.shape_cast %16 : vector<32xf32> to vector<1x32xf32>
    %cst_12 = arith.constant 8.000000e+00 : f32
    %18 = vector.broadcast %cst_12 : f32 to vector<1x32xf32>
    %19 = arith.divf %17, %18 : vector<1x32xf32>
    %20 = vector.broadcast %12 : vector<1x32xf32> to vector<8x32xf32>
    %21 = arith.subf %2, %20 : vector<8x32xf32>
    %cst_13 = arith.constant 9.99999997E-7 : f32
    %22 = vector.broadcast %cst_13 : f32 to vector<1x32xf32>
    %23 = arith.addf %19, %22 : vector<1x32xf32>
    %24 = math.rsqrt %23 : vector<1x32xf32>
    %25 = vector.broadcast %24 : vector<1x32xf32> to vector<8x32xf32>
    %26 = arith.mulf %21, %25 : vector<8x32xf32>
    %27 = vector.broadcast %7 : vector<8x1xf32> to vector<8x32xf32>
    %28 = arith.mulf %27, %26 : vector<8x32xf32>
    %29 = vector.broadcast %8 : vector<8x1xf32> to vector<8x32xf32>
    %30 = arith.addf %28, %29 : vector<8x32xf32>
    %cst_14 = arith.constant dense<0.000000e+00> : vector<8x32xf32>
    %31 = tpu.matmul %30, %4, %cst_14 {dimension_numbers = #tpu.dot_dimension_numbers<[1], [0], [0], [1], [0, 0, 1, 1], [], []>} : vector<8x32xf32>, vector<32x32xf32>, vector<8x32xf32> -> vector<8x32xf32>
    %32 = vector.broadcast %6 : vector<1x32xf32> to vector<8x32xf32>
    %33 = arith.addf %31, %32 : vector<8x32xf32>
    %c0_15 = arith.constant 0 : index
    %c0_16 = arith.constant 0 : index
    %c0_17 = arith.constant 0 : index
    %34 = vector.load %arg7[%c0_15, %c0_16, %c0_17] : memref<1x8x32xf32, #tpu.memory_space<vmem>>, vector<1x8x32xf32>
    %35 = vector.shape_cast %34 : vector<1x8x32xf32> to vector<8x32xf32>
    %36 = vector.shape_cast %33 : vector<8x32xf32> to vector<1x8x32xf32>
    tpu.vector_store %arg7[%c0_15, %c0_16, %c0_17], %36 {strides = array<i32>} : memref<1x8x32xf32, #tpu.memory_space<vmem>>, vector<1x8x32xf32>,
    %c0_18 = arith.constant 0 : index
    %c0_19 = arith.constant 0 : index
    %c0_20 = arith.constant 0 : index
    %37 = vector.load %arg2[%c0_18, %c0_19, %c0_20] : memref<1x8x32xf32, #tpu.memory_space<vmem>>, vector<1x8x32xf32>
    %38 = vector.shape_cast %37 : vector<1x8x32xf32> to vector<8x32xf32>
    %c1 = arith.constant 1 : index
    %c0_21 = arith.constant 0 : index
    %c0_22 = arith.constant 0 : index
    %39 = vector.load %arg5[%c1, %c0_21, %c0_22] : memref<3x32x32xf32, #tpu.memory_space<vmem>>, vector<1x32x32xf32>
    %40 = vector.shape_cast %39 : vector<1x32x32xf32> to vector<32x32xf32>
    %c1_23 = arith.constant 1 : index
    %c0_24 = arith.constant 0 : index
    %c0_25 = arith.constant 0 : index
    %41 = vector.load %arg6[%c1_23, %c0_24, %c0_25] : memref<3x1x32xf32, #tpu.memory_space<vmem>>, vector<1x1x32xf32>
    %42 = vector.shape_cast %41 : vector<1x1x32xf32> to vector<1x32xf32>
    %43 = vector.extract_strided_slice %0 {offsets = [0, 2], sizes = [8, 1], strides = [1, 1]} : vector<8x6xf32> to vector<8x1xf32>
    %44 = vector.extract_strided_slice %0 {offsets = [0, 3], sizes = [8, 1], strides = [1, 1]} : vector<8x6xf32> to vector<8x1xf32>
    %cst_26 = arith.constant dense<0.000000e+00> : vector<32xf32>
    %45 = vector.multi_reduction <add>, %38, %cst_26 [0] : vector<8x32xf32> to vector<32xf32>
    %46 = vector.shape_cast %45 : vector<32xf32> to vector<1x32xf32>
    %cst_27 = arith.constant 8.000000e+00 : f32
    %47 = vector.broadcast %cst_27 : f32 to vector<1x32xf32>
    %48 = arith.divf %46, %47 : vector<1x32xf32>
    %49 = vector.broadcast %48 : vector<1x32xf32> to vector<8x32xf32>
    %50 = arith.subf %38, %49 : vector<8x32xf32>
    %51 = arith.mulf %50, %50 : vector<8x32xf32>
    %cst_28 = arith.constant dense<0.000000e+00> : vector<32xf32>
    %52 = vector.multi_reduction <add>, %51, %cst_28 [0] : vector<8x32xf32> to vector<32xf32>
    %53 = vector.shape_cast %52 : vector<32xf32> to vector<1x32xf32>
    %cst_29 = arith.constant 8.000000e+00 : f32
    %54 = vector.broadcast %cst_29 : f32 to vector<1x32xf32>
    %55 = arith.divf %53, %54 : vector<1x32xf32>
    %56 = vector.broadcast %48 : vector<1x32xf32> to vector<8x32xf32>
    %57 = arith.subf %38, %56 : vector<8x32xf32>
    %cst_30 = arith.constant 9.99999997E-7 : f32
    %58 = vector.broadcast %cst_30 : f32 to vector<1x32xf32>
    %59 = arith.addf %55, %58 : vector<1x32xf32>
    %60 = math.rsqrt %59 : vector<1x32xf32>
    %61 = vector.broadcast %60 : vector<1x32xf32> to vector<8x32xf32>
    %62 = arith.mulf %57, %61 : vector<8x32xf32>
    %63 = vector.broadcast %43 : vector<8x1xf32> to vector<8x32xf32>
    %64 = arith.mulf %63, %62 : vector<8x32xf32>
    %65 = vector.broadcast %44 : vector<8x1xf32> to vector<8x32xf32>
    %66 = arith.addf %64, %65 : vector<8x32xf32>
    %cst_31 = arith.constant dense<0.000000e+00> : vector<8x32xf32>
    %67 = tpu.matmul %66, %40, %cst_31 {dimension_numbers = #tpu.dot_dimension_numbers<[1], [0], [0], [1], [0, 0, 1, 1], [], []>} : vector<8x32xf32>, vector<32x32xf32>, vector<8x32xf32> -> vector<8x32xf32>
    %68 = vector.broadcast %42 : vector<1x32xf32> to vector<8x32xf32>
    %69 = arith.addf %67, %68 : vector<8x32xf32>
    %c0_32 = arith.constant 0 : index
    %c0_33 = arith.constant 0 : index
    %c0_34 = arith.constant 0 : index
    %70 = vector.load %arg8[%c0_32, %c0_33, %c0_34] : memref<1x8x32xf32, #tpu.memory_space<vmem>>, vector<1x8x32xf32>
    %71 = vector.shape_cast %70 : vector<1x8x32xf32> to vector<8x32xf32>
    %72 = vector.shape_cast %69 : vector<8x32xf32> to vector<1x8x32xf32>
    tpu.vector_store %arg8[%c0_32, %c0_33, %c0_34], %72 {strides = array<i32>} : memref<1x8x32xf32, #tpu.memory_space<vmem>>, vector<1x8x32xf32>,
    %c0_35 = arith.constant 0 : index
    %c0_36 = arith.constant 0 : index
    %c0_37 = arith.constant 0 : index
    %73 = vector.load %arg3[%c0_35, %c0_36, %c0_37] : memref<1x8x32xf32, #tpu.memory_space<vmem>>, vector<1x8x32xf32>
    %74 = vector.shape_cast %73 : vector<1x8x32xf32> to vector<8x32xf32>
    %c2 = arith.constant 2 : index
    %c0_38 = arith.constant 0 : index
    %c0_39 = arith.constant 0 : index
    %75 = vector.load %arg5[%c2, %c0_38, %c0_39] : memref<3x32x32xf32, #tpu.memory_space<vmem>>, vector<1x32x32xf32>
    %76 = vector.shape_cast %75 : vector<1x32x32xf32> to vector<32x32xf32>
    %c2_40 = arith.constant 2 : index
    %c0_41 = arith.constant 0 : index
    %c0_42 = arith.constant 0 : index
    %77 = vector.load %arg6[%c2_40, %c0_41, %c0_42] : memref<3x1x32xf32, #tpu.memory_space<vmem>>, vector<1x1x32xf32>
    %78 = vector.shape_cast %77 : vector<1x1x32xf32> to vector<1x32xf32>
    %79 = vector.extract_strided_slice %0 {offsets = [0, 4], sizes = [8, 1], strides = [1, 1]} : vector<8x6xf32> to vector<8x1xf32>
    %80 = vector.extract_strided_slice %0 {offsets = [0, 5], sizes = [8, 1], strides = [1, 1]} : vector<8x6xf32> to vector<8x1xf32>
    %cst_43 = arith.constant dense<0.000000e+00> : vector<32xf32>
    %81 = vector.multi_reduction <add>, %74, %cst_43 [0] : vector<8x32xf32> to vector<32xf32>
    %82 = vector.shape_cast %81 : vector<32xf32> to vector<1x32xf32>
    %cst_44 = arith.constant 8.000000e+00 : f32
    %83 = vector.broadcast %cst_44 : f32 to vector<1x32xf32>
    %84 = arith.divf %82, %83 : vector<1x32xf32>
    %85 = vector.broadcast %84 : vector<1x32xf32> to vector<8x32xf32>
    %86 = arith.subf %74, %85 : vector<8x32xf32>
    %87 = arith.mulf %86, %86 : vector<8x32xf32>
    %cst_45 = arith.constant dense<0.000000e+00> : vector<32xf32>
    %88 = vector.multi_reduction <add>, %87, %cst_45 [0] : vector<8x32xf32> to vector<32xf32>
    %89 = vector.shape_cast %88 : vector<32xf32> to vector<1x32xf32>
    %cst_46 = arith.constant 8.000000e+00 : f32
    %90 = vector.broadcast %cst_46 : f32 to vector<1x32xf32>
    %91 = arith.divf %89, %90 : vector<1x32xf32>
    %92 = vector.broadcast %84 : vector<1x32xf32> to vector<8x32xf32>
    %93 = arith.subf %74, %92 : vector<8x32xf32>
    %cst_47 = arith.constant 9.99999997E-7 : f32
    %94 = vector.broadcast %cst_47 : f32 to vector<1x32xf32>
    %95 = arith.addf %91, %94 : vector<1x32xf32>
    %96 = math.rsqrt %95 : vector<1x32xf32>
    %97 = vector.broadcast %96 : vector<1x32xf32> to vector<8x32xf32>
    %98 = arith.mulf %93, %97 : vector<8x32xf32>
    %99 = vector.broadcast %79 : vector<8x1xf32> to vector<8x32xf32>
    %100 = arith.mulf %99, %98 : vector<8x32xf32>
    %101 = vector.broadcast %80 : vector<8x1xf32> to vector<8x32xf32>
    %102 = arith.addf %100, %101 : vector<8x32xf32>
    %cst_48 = arith.constant dense<0.000000e+00> : vector<8x32xf32>
    %103 = tpu.matmul %102, %76, %cst_48 {dimension_numbers = #tpu.dot_dimension_numbers<[1], [0], [0], [1], [0, 0, 1, 1], [], []>} : vector<8x32xf32>, vector<32x32xf32>, vector<8x32xf32> -> vector<8x32xf32>
    %104 = vector.broadcast %78 : vector<1x32xf32> to vector<8x32xf32>
    %105 = arith.addf %103, %104 : vector<8x32xf32>
    %c0_49 = arith.constant 0 : index
    %c0_50 = arith.constant 0 : index
    %c0_51 = arith.constant 0 : index
    %106 = vector.load %arg9[%c0_49, %c0_50, %c0_51] : memref<1x8x32xf32, #tpu.memory_space<vmem>>, vector<1x8x32xf32>
    %107 = vector.shape_cast %106 : vector<1x8x32xf32> to vector<8x32xf32>
    %108 = vector.shape_cast %105 : vector<8x32xf32> to vector<1x8x32xf32>
    tpu.vector_store %arg9[%c0_49, %c0_50, %c0_51], %108 {strides = array<i32>} : memref<1x8x32xf32, #tpu.memory_space<vmem>>, vector<1x8x32xf32>,
    return
  }
  func.func @transform_0(%arg0: i32) -> (i32, i32, i32) {
    %c0_i32 = arith.constant 0 : i32
    %c0_i32_0 = arith.constant 0 : i32
    %c0_i32_1 = arith.constant 0 : i32
    return %arg0, %c0_i32, %c0_i32_0 : i32, i32, i32
  }
  func.func @transform_1(%arg0: i32) -> (i32, i32, i32) {
    %c0_i32 = arith.constant 0 : i32
    %c0_i32_0 = arith.constant 0 : i32
    %c0_i32_1 = arith.constant 0 : i32
    return %arg0, %c0_i32, %c0_i32_0 : i32, i32, i32
  }
  func.func @transform_2(%arg0: i32) -> (i32, i32, i32) {
    %c0_i32 = arith.constant 0 : i32
    %c0_i32_0 = arith.constant 0 : i32
    %c0_i32_1 = arith.constant 0 : i32
    return %arg0, %c0_i32, %c0_i32_0 : i32, i32, i32
  }
  func.func @transform_3(%arg0: i32) -> (i32, i32) {
    %c0_i32 = arith.constant 0 : i32
    %c0_i32_0 = arith.constant 0 : i32
    %c0_i32_1 = arith.constant 0 : i32
    return %c0_i32, %c0_i32_0 : i32, i32
  }
  func.func @transform_4(%arg0: i32) -> (i32, i32, i32) {
    %c0_i32 = arith.constant 0 : i32
    %c0_i32_0 = arith.constant 0 : i32
    %c0_i32_1 = arith.constant 0 : i32
    %c0_i32_2 = arith.constant 0 : i32
    return %c0_i32, %c0_i32_0, %c0_i32_1 : i32, i32, i32
  }
  func.func @transform_5(%arg0: i32) -> (i32, i32, i32) {
    %c0_i32 = arith.constant 0 : i32
    %c0_i32_0 = arith.constant 0 : i32
    %c0_i32_1 = arith.constant 0 : i32
    %c0_i32_2 = arith.constant 0 : i32
    return %c0_i32, %c0_i32_0, %c0_i32_1 : i32, i32, i32
  }
  func.func @transform_6(%arg0: i32) -> (i32, i32, i32) {
    %c0_i32 = arith.constant 0 : i32
    %c0_i32_0 = arith.constant 0 : i32
    %c0_i32_1 = arith.constant 0 : i32
    return %arg0, %c0_i32, %c0_i32_0 : i32, i32, i32
  }
  func.func @transform_7(%arg0: i32) -> (i32, i32, i32) {
    %c0_i32 = arith.constant 0 : i32
    %c0_i32_0 = arith.constant 0 : i32
    %c0_i32_1 = arith.constant 0 : i32
    return %arg0, %c0_i32, %c0_i32_0 : i32, i32, i32
  }
  func.func @transform_8(%arg0: i32) -> (i32, i32, i32) {
    %c0_i32 = arith.constant 0 : i32
    %c0_i32_0 = arith.constant 0 : i32
    %c0_i32_1 = arith.constant 0 : i32
    return %arg0, %c0_i32, %c0_i32_0 : i32, i32, i32
  }
}

</mosaic_0001>

<bundles_post_ra>
// kernel: tpu_custom_call.1
= control target key start
LH: loop header
LB: loop body
LE: loop exit
PB: predicated region body
PF: predicated region fallthrough
CT: control target
= control target key end

     0   :  { %s1945_s0 = inlined_call_operand.hbm [shape: f32[2,8,32], index: 0, kind: input, shape index: {}]   ;;  %s1946_s1 = inlined_call_operand.hbm [shape: f32[2,8,32], index: 1, kind: input, shape index: {}]   ;;  %s1947_s2 = inlined_call_operand.hbm [shape: f32[2,8,32], index: 2, kind: input, shape index: {}]   ;;  %s1948_s3 = inlined_call_operand.vmem [shape: f32[8,6], index: 3, kind: input, shape index: {}]   ;;  %s1949_s4 = inlined_call_operand.hbm [shape: f32[3,32,32], index: 4, kind: input, shape index: {}]   ;;  %s1950_s5 = inlined_call_operand.vmem [shape: f32[3,1,32], index: 5, kind: input, shape index: {}]   ;;  %s1951_s6 = inlined_call_operand.hbm [shape: f32[2,8,32], index: 6, kind: output, shape index: {0}]   ;;  %s1952_s7 = inlined_call_operand.hbm [shape: f32[2,8,32], index: 7, kind: output, shape index: {1}]   ;;  %s1953_s8 = inlined_call_operand.hbm [shape: f32[2,8,32], index: 8, kind: output, shape index: {2}]  }
   0x1   :  { %1976 = sst [smem:[#allocation25_spill]] %s1946_s1 }
   0x2   :  { %1977 = sst [smem:[#allocation26_spill]] %s1951_s6 }
   0x3   :  { %1978 = sst [smem:[#allocation27_spill]] %s1952_s7 }
   0x4   :  { %1979 = sst [smem:[#allocation28_spill]] %s1953_s8 }
   0x5   :  { %14 = vsyncpa [#allocation3], 0 }
   0x6   :  { %16 = vsyncpa [#allocation3 + $0x1], 0 }
   0x7   :  { %17 = vsyncpa [#allocation6], 0 }
   0x8   :  { %19 = vsyncpa [#allocation6 + $0x1], 0 }
   0x9   :  { %20 = vsyncpa [#allocation9], 0 }
   0xa   :  { %21 = vsyncpa [#allocation4], 0 }
   0xb   :  { %23 = vsyncpa [#allocation4 + $0x1], 0 }
   0xc   :  { %24 = vsyncpa [#allocation12], 0 }
   0xd   :  { %26 = vsyncpa [#allocation12 + $0x1], 0  ;;  %s1535_s27 = smov 0   ;;  %s1537_s28 = smov 0  }
   0xe   :  { %s1539_s29 = smov 0   ;;  %s1541_s30 = smov 0  }
   0xf LB: > { %1980 = sst [smem:[#allocation19_spill]] %s1458_s27  ;;  %s1556_s9 = sadd.s32 1, %s1470_s30   ;;  %s1470_s30 = sphi %s1541_s30, %s2014_s30   ;;  %s1466_s29 = sphi %s1539_s29, %s2018_s29   ;;  %s1462_s28 = sphi %s1537_s28, %s2017_s28   ;;  %s1458_s27 = sphi %s1535_s27, %s2016_s27  }
  0x10   : > { %1981 = sst [smem:[#allocation20_spill]] %s1470_s30  ;;  %s39_s10 = sadd.s32 1, %s1466_s29 }
  0x11   : > { %1982 = sst [smem:[#allocation21_spill]] %s1556_s9  ;;  %s36_s11 = ssub.s32 %s1470_s30, %s1556_s9 }
  0x12   : > { %p1954_p0 = scmp.ne.s32.totalorder %s1466_s29, %s1462_s28  ;;  %p37_p1 = scmp.eq.s32.totalorder %s36_s11, 0 }
  0x13   : > { %p47_p2 = scmp.eq.s32.totalorder %s1470_s30, 0  ;;  %p1159_p4 = scmp.lt.s32.totalorder %s1470_s30, 2 }
  0x14   : > { %s1567_s12 = scalar_select %p37_p1, %s1466_s29, %s39_s10  }
  0x15   : > { %p48_p5 = por %p47_p2, %p1954_p0  ;;  %s1956_s13 = sand.u32 1, %s1466_s29  }
  0x16   : > { %1983 = sst [smem:[#allocation22_spill]] %s1567_s12  ;;  %s1575_s14 = sshll.u32 %s1956_s13, 3 }
  0x17   : > { %s1578_s15 = sshll.u32 %s1470_s30, 7  ;;  %p1580_p6 = pnand %p1159_p4, %p48_p5 }
  0x18   : > { %s306_s17 = sand.u32 1, %s1470_s30   ;;  %s1985_s1 = sld [smem:[#allocation25_spill]] }
  0x19   : > { %s1984_s16 = scalar_select %p1580_p6, 1, 0 }
  0x1a   : > { %s310_s21 = scalar_lea.vmem [#allocation5], %s1575_s14  ;;  %s1594_s23 = scalar_lea.sflag [#allocation6], %s306_s17 }
  0x1b   : > { %s317_s22 = sshll.u32 %s310_s21, 4  ;;  %p1600_p8 = pneg %p1580_p6  ;;  %s1592_s22 = int_to_ptr.vmem [resolvable:$true] %s317_s22 }
  0x1d   : > { %s1986_s25 = scalar_select %p1600_p8, 1, 0 }
  0x1e   : > { %s1589_s20 = scalar_lea.hbm %s1985_s1, %s1578_s15  ;;  %s1223_s11 = scalar_lea.hbm %s1985_s1, 256 }
  0x1f   : > { %s1218_s24 = scalar_lea.hbm %s1589_s20, 128  ;;  %p1224_p11 = scmp.lt.u32.totalorder %s1589_s20, %s1985_s1 }
  0x20   : > { %p1219_p7 = scmp.ne.s32.totalorder %s1589_s20, %s1218_s24  ;;  %p1225_p12 = scmp.lt.u32.totalorder %s1223_s11, %s1218_s24 }
  0x21   : > { %p1227_p1 = scmp.lt.u32.totalorder %s1218_s24, %s1589_s20 }
  0x22   : > { %p1221_p9 = pnand %p1600_p8, %p1219_p7  ;;  %p1226_p13 = por %p1225_p12, %p1224_p11 }
  0x24   : > { %p1222_p10 = pneg %p1221_p9  ;;  %p1228_p2 = por %p1227_p1, %p1226_p13 }
  0x26   : > { %p1229_p4 = pnand %p1228_p2, %p1222_p10 }
  0x28   : > { %1232 = shalt.err (!%p1229_p4)
}
  0x29   : > { %s1233_s17 = scalar_lea.vmem %s1592_s22, 128  ;;  %s1472_s21 = smov [#allocation5]  }
  0x2a   : > { %p1234_p5 = scmp.ne.s32.totalorder %s1592_s22, %s1233_s17  ;;  %s1238_s26 = sshll.u32 %s1472_s21, 4  ;;  %s1239_s26 = int_to_ptr.vmem [resolvable:$false] %s1238_s26 }
  0x2b   : > { %s1240_s10 = scalar_lea.vmem %s1239_s26, 256  ;;  %p1241_p3 = scmp.lt.s32.totalorder %s1592_s22, %s1239_s26 }
  0x2c   : > { %p1236_p7 = pnand %p1234_p5, %p1600_p8  ;;  %p1242_p0 = scmp.lt.s32.totalorder %s1240_s10, %s1233_s17 }
  0x2e   : > { %p1237_p9 = pneg %p1236_p7  ;;  %p1243_p11 = por %p1242_p0, %p1241_p3 }
  0x30   : > { %p1244_p12 = pnand %p1243_p11, %p1237_p9 }
  0x32   : > { %1247 = shalt.err (!%p1244_p12)
}
  0x33   : > { %1144 = dma.hbm_to_vmem [thread:$0]  (!%p1580_p6), %s1589_s20, 128, %s1592_s22, %s1594_s23  }
  0x34   : > { %s1625_s24 = sadd.s32 4294967295, %s1470_s30   ;;  %s1955_s11 = sadd.s32 4294967294, %s1470_s30  }
  0x35   : > { %p52_p0 = scmp.ne.s32.totalorder %s1462_s28, %s1458_s27  ;;  %p1965_p3 = scmp.eq.s32.totalorder %s1625_s24, 0 }
  0x36   : > { %p191_p10 = scmp.eq.s32.totalorder %s1625_s24, 1  ;;  %p197_p13 = scmp.eq.s32.totalorder %s1955_s11, 1 }
  0x37   : > { %p1636_p1 = por %p1965_p3, %p52_p0  ;;  %p1019_p2 = scmp.ge.s32.totalorder %s1470_s30, 1 }
  0x38   : > { %p1988_p4 = scmp.ne.s32.totalorder %s1466_s29, %s1462_s28  ;;  %p1648_p7 = por %p197_p13, %p52_p0 }
  0x39   : > { %s1987_s18 = scalar_select %p1636_p1, 1, 0 }
  0x3a   : > { %p1644_p5 = por %p191_p10, %p1988_p4  ;;  %p256_p9 = scmp.lt.s32.totalorder %s1470_s30, 3 }
  0x3b   : > { %s1991_s22 = scalar_select %p1648_p7, 1, 0 }
  0x3c   : > { %s1989_s20 = scalar_select %p1644_p5, 1, 0 }
  0x3d   : > { %1992 = sst [smem:[#allocation24_spill]] %s1991_s22  ;;  %p1653_p11 = pnand %p1019_p2, %p256_p9 }
  0x3e   : > { %1990 = sst [smem:[#allocation23_spill]] %s1989_s20  ;;  %s1473_s17 = smov [#allocation8]  }
  0x3f   : > { %s1993_s19 = scalar_select %p1653_p11, 1, 0 }
  0x40   : > { %s271_s21 = sshll.u32 %s1473_s17, 4  ;;  %p1134_p12 = pneg %p1653_p11  ;;  %s1657_s21 = int_to_ptr.vmem [resolvable:$true] %s271_s21 }
  0x41   : > { %s1665_s11 = scalar_lea.hbm %s1945_s0, %s1578_s15  ;;  %s292_s1 = scalar_lea.vmem [#allocation2], %s1575_s14 }
  0x42   : > { %p1669_p0 = pnand %p1134_p12, %p1965_p3  ;;  %s299_s12 = sshll.u32 %s292_s1, 4  ;;  %s1674_s12 = int_to_ptr.vmem [resolvable:$true] %s299_s12 }
  0x43   : > { %s1680_s30 = scalar_lea.hbm %s1947_s2, %s1578_s15  ;;  %s1248_s26 = scalar_lea.hbm %s1949_s4, 1536 }
  0x44   : > { %p1249_p10 = scmp.ne.s32.totalorder %s1949_s4, %s1248_s26  ;;  %p1250_p13 = pneg %p1669_p0 }
  0x45   : > { %p1255_p9 = scmp.lt.u32.totalorder %s1248_s26, %s1949_s4 }
  0x46   : > { %p1251_p2 = pnand %p1250_p13, %p1249_p10 }
  0x48   : > { %p1252_p4 = pneg %p1251_p2 }
  0x4a   : > { %p1257_p12 = pnand %p1255_p9, %p1252_p4 }
  0x4c   : > { %1260 = shalt.err (!%p1257_p12)
}
  0x4d   : > { %s1261_s9 = scalar_lea.vmem %s1657_s21, 1536  ;;  %p1269_p1 = scmp.lt.s32.totalorder %s1657_s21, %s1657_s21 }
  0x4e   : > { %p1262_p3 = scmp.ne.s32.totalorder %s1657_s21, %s1261_s9  ;;  %p1270_p11 = scmp.lt.s32.totalorder %s1261_s9, %s1261_s9 }
  0x50   : > { %p1264_p7 = pnand %p1262_p3, %p1250_p13  ;;  %p1271_p6 = por %p1270_p11, %p1269_p1 }
  0x52   : > { %p1265_p5 = pneg %p1264_p7 }
  0x54   : > { %p1272_p8 = pnand %p1271_p6, %p1265_p5 }
  0x56   : > { %1275 = shalt.err (!%p1272_p8)
}
  0x57   : > { %s1474_s8 = smov 128   ;;  %s1475_s7 = smov 8  }
  0x58   : > { %1137 = dma.hbm_to_vmem [thread:$0]  (!%p1669_p0), %s1949_s4, 1536, %s1657_s21, [#allocation9], %s1474_s8, %s1474_s8, %s1475_s7  }
  0x59   : > { %s1995_s22 = sand.u32 1, %s1466_s29   ;;  %s1276_s26 = scalar_lea.hbm %s1665_s11, 128 }
  0x5a   : > { %s289_s17 = scalar_lea.sflag [#allocation3], %s1995_s22  ;;  %p1277_p6 = scmp.ne.s32.totalorder %s1665_s11, %s1276_s26 }
  0x5b   : > { %p1996_p8 = scmp.ne.s32.totalorder %s1986_s25, 0  ;;  %s1281_s9 = scalar_lea.hbm %s1945_s0, 256 }
  0x5c   : > { %p1282_p5 = scmp.lt.u32.totalorder %s1665_s11, %s1945_s0  ;;  %p1283_p7 = scmp.lt.u32.totalorder %s1281_s9, %s1276_s26 }
  0x5d   : > { %p1279_p3 = pnand %p1277_p6, %p1996_p8  ;;  %p1285_p10 = scmp.lt.u32.totalorder %s1276_s26, %s1665_s11 }
  0x5e   : > { %p1284_p11 = por %p1283_p7, %p1282_p5 }
  0x5f   : > { %p1280_p1 = pneg %p1279_p3 }
  0x60   : > { %p1286_p13 = por %p1285_p10, %p1284_p11 }
  0x62   : > { %p1287_p0 = pnand %p1286_p13, %p1280_p1 }
  0x64   : > { %1290 = shalt.err (!%p1287_p0)
}
  0x65   : > { %s1291_s13 = scalar_lea.vmem %s1674_s12, 128  ;;  %s1476_s21 = smov [#allocation2]  }
  0x66   : > { %p1292_p2 = scmp.ne.s32.totalorder %s1674_s12, %s1291_s13  ;;  %s1296_s8 = sshll.u32 %s1476_s21, 4  ;;  %s1297_s8 = int_to_ptr.vmem [resolvable:$false] %s1296_s8 }
  0x67   : > { %s1298_s6 = scalar_lea.vmem %s1297_s8, 256  ;;  %p1299_p12 = scmp.lt.s32.totalorder %s1674_s12, %s1297_s8 }
  0x68   : > { %p1294_p4 = pnand %p1292_p2, %p1996_p8  ;;  %p1300_p6 = scmp.lt.s32.totalorder %s1298_s6, %s1291_s13 }
  0x6a   : > { %p1295_p9 = pneg %p1294_p4  ;;  %p1301_p3 = por %p1300_p6, %p1299_p12 }
  0x6c   : > { %p1302_p5 = pnand %p1301_p3, %p1295_p9 }
  0x6e   : > { %1305 = shalt.err (!%p1302_p5)
}
  0x6f   : > { %p1997_p1 = scmp.ne.s32.totalorder %s1984_s16, 0  ;;  %s328_s20 = scalar_lea.vmem [#allocation7], %s1575_s14 }
  0x70   : > { %s335_s7 = sshll.u32 %s328_s20, 4  ;;  %s1306_s27 = scalar_lea.hbm %s1680_s30, 128  ;;  %s336_s7 = int_to_ptr.vmem [resolvable:$true] %s335_s7 }
  0x71   : > { %1141 = dma.hbm_to_vmem [thread:$0]  (!%p1997_p1), %s1665_s11, 128, %s1674_s12, %s289_s17  }
  0x72   : > { %p1307_p7 = scmp.ne.s32.totalorder %s1680_s30, %s1306_s27  ;;  %s1311_s26 = scalar_lea.hbm %s1947_s2, 256 }
  0x73   : > { %p1312_p13 = scmp.lt.u32.totalorder %s1680_s30, %s1947_s2  ;;  %p1313_p0 = scmp.lt.u32.totalorder %s1311_s26, %s1306_s27 }
  0x74   : > { %p1309_p11 = pnand %p1307_p7, %p1996_p8  ;;  %p1315_p4 = scmp.lt.u32.totalorder %s1306_s27, %s1680_s30 }
  0x75   : > { %p1314_p2 = por %p1313_p0, %p1312_p13 }
  0x76   : > { %p1310_p10 = pneg %p1309_p11 }
  0x77   : > { %p1316_p9 = por %p1315_p4, %p1314_p2 }
  0x79   : > { %p1317_p12 = pnand %p1316_p9, %p1310_p10 }
  0x7b   : > { %1320 = shalt.err (!%p1317_p12)
}
  0x7c   : > { %s1321_s12 = scalar_lea.vmem %s336_s7, 128  ;;  %s1477_s14 = smov [#allocation7]  }
  0x7d   : > { %p1322_p6 = scmp.ne.s32.totalorder %s336_s7, %s1321_s12  ;;  %s1326_s11 = sshll.u32 %s1477_s14, 4  ;;  %s1327_s11 = int_to_ptr.vmem [resolvable:$false] %s1326_s11 }
  0x7e   : > { %s1328_s17 = scalar_lea.vmem %s1327_s11, 256  ;;  %p1329_p7 = scmp.lt.s32.totalorder %s336_s7, %s1327_s11 }
  0x7f   : > { %p1324_p3 = pnand %p1322_p6, %p1996_p8  ;;  %p1330_p11 = scmp.lt.s32.totalorder %s1328_s17, %s1321_s12 }
  0x81   : > { %p1325_p5 = pneg %p1324_p3  ;;  %p1331_p1 = por %p1330_p11, %p1329_p7 }
  0x83   : > { %p1332_p0 = pnand %p1331_p1, %p1325_p5 }
  0x85   : > { %1335 = shalt.err (!%p1332_p0)
}
  0x86   : > { %p1998_p13 = scmp.ne.s32.totalorder %s1984_s16, 0  ;;  %p1999_p10 = scmp.ne.s32.totalorder %s1993_s19, 0 }
  0x87   : > { %s1748_s25 = sand.u32 (!%p1999_p10), 1, %s1462_s28   ;;  %p2000_p8 = scmp.ne.s32.totalorder (!%p1999_p10), %s1987_s18, 0 }
  0x88   : > { %1147 = dma.hbm_to_vmem [thread:$0]  (!%p1998_p13), %s1680_s30, 128, %s336_s7, %s1594_s23  }
  0x89   : > { %344 = sbr.rel (%p1999_p10) target bundleno = 566 (0x236), region = 44  ;;  %s1751_s9 = sshll.u32 (!%p1999_p10), %s1748_s25, 3 }
  0x8a   : > { %s347_s13 = scalar_lea.sflag (!%p1999_p10), [#allocation3], %s1748_s25  ;;  %s350_s21 = scalar_lea.vmem (!%p1999_p10), [#allocation2], %s1751_s9 }
  0x90   : > { %1437 = dma.done.wait (%p2000_p8), %s347_s13, 128  }
  0x91   : > { %1439 = vsyncadd (%p2000_p8), %s347_s13, 4294967168  ;;  %s355_s30 = sand.u32 1, %s1625_s24   ;;  %s359_s23 = scalar_lea.vmem [#allocation5], %s1751_s9 }
  0x92   : > { %s356_s16 = scalar_lea.sflag [#allocation6], %s355_s30 }
  0x93   : > { %1441 = dma.done.wait (%p2000_p8), %s356_s16, 256  }
  0x94   : > { %1443 = vsyncadd (%p2000_p8), %s356_s16, 4294967040  ;;  %s368_s19 = scalar_lea.vmem [#allocation7], %s1751_s9  ;;  %p2001_p1 = scmp.eq.s32.totalorder %s1625_s24, 0 }
  0x96   : > { %1445 = dma.done.wait (%p2001_p1), [#allocation9], 1536   ;;  %p2002_p2 = pmov %p2001_p1 }
  0x97   : > { %v1478_v0 = vmov 2   ;;  %v1479_v1 = vmov 0   ;;  %v1480_v2 = vmov 0.0|0.0   ;;  %v425_v3 = vld [vmem:[%s1948_s3] sm:$0xff]  ;;  %v427_v4 = vld [vmem:[#allocation8] sm:$0xff]  ;;  %v428_v5 = vld [vmem:[#allocation8 + $0x8] sm:$0xff] }
  0x98   : > { %1447 = vsyncadd (%p2002_p2), [#allocation9], 4294965760  ;;  %1208 = vset.pattern.permute.xlu1 %v1478_v0  ;;  %1206 = vset.pattern.permute.xlu0 %v1479_v1  ;;  %v1101_v6 = vpack.c.bf16 %v428_v5, %v427_v4  ;;  %v429_v7 = vld [vmem:[#allocation8 + $0x10] sm:$0xff]  ;;  %v430_v8 = vld [vmem:[#allocation8 + $0x18] sm:$0xff]  ;;  %v1481_v13 = vmov 4   ;;  %v1482_v14 = vmov 1  }
  0x99   : > { %1100 = vmatprep.subr.bf16.mxu0 %v1480_v2  ;;  %1106 = vmatprep.subr.bf16.mxu1 %v1480_v2  ;;  %v1104_v9 = vpack.c.bf16 %v430_v8, %v429_v7  ;;  %v548_v10 = vld [vmem:[#allocation8 + $0x20] sm:$0xff]  ;;  %v549_v11 = vld [vmem:[#allocation8 + $0x28] sm:$0xff]  ;;  %vm1483_vm0 = vmmov 0   ;;  %v1484_v15 = vmov 0.0   ;;  %v550_v16 = vld [vmem:[#allocation8 + $0x30] sm:$0xff]  ;;  %v1485_v19 = vmov 3  }
  0x9a   : > { %576 = vperm.xlu1 %1208, %v425_v3   ;;  %457 = vperm.xlu0 %1206, %v425_v3   ;;  %v1107_v12 = vpack.c.bf16 %v549_v11, %v548_v10  ;;  %v551_v17 = vld [vmem:[#allocation8 + $0x38] sm:$0xff]  ;;  %v1486_v20 = vmov 5   ;;  %vm432_vm1 = vcmask 261120   ;;  %v546_v23 = vld [vmem:[%s359_s23] sm:$0xff]  ;;  %s2003_s7 = sld [smem:[#allocation23_spill]]  ;;  %s1806_s27 = sshll.u32 %s1625_s24, 7 }
  0x9b   : > { %1102 = vmatpush3.bf16.msra.mxu0 %v1101_v6  ;;  %1075 = vmatprep.mubr.msk.f32.mxu0 %vm1483_vm0, %v1484_v15  ;;  %v1110_v18 = vpack.c.bf16 %v551_v17, %v550_v16  ;;  %v426_v21 = vld [vmem:[%s350_s21] sm:$0xff]  ;;  %v554_v25 = vsel %vm432_vm1, %v546_v23, 0.0  ;;  %s410_s15 = scalar_lea.vmem [#allocation10], %s1751_s9  ;;  %s2004_s1 = sld [smem:[#allocation26_spill]] }
  0x9c   : > { %1103 = vmatprep.subr.bf16.mxu0 %v1480_v2  ;;  %1108 = vmatpush3.bf16.msra.mxu1 %v1107_v12  ;;  %v433_v22 = vsel %vm432_vm1, %v426_v21, 0.0  ;;  %v665_v26 = vld [vmem:[%s368_s19] sm:$0xff]  ;;  %v555_v28 = vrot.slane %v554_v25, 4  ;;  %s808_s22 = sshll.u32 %s410_s15, 4  ;;  %s417_s17 = scalar_lea.vmem [#allocation11], %s1751_s9  ;;  %s1815_s22 = int_to_ptr.vmem [resolvable:$true] %s808_s22 }
  0x9d   : > { %1109 = vmatprep.subr.bf16.mxu1 %v1480_v2  ;;  %1086 = vmatprep.mubr.msk.f32.mxu1 %vm1483_vm0, %v1484_v15  ;;  %v434_v24 = vrot.slane %v433_v22, 4  ;;  %v673_v29 = vsel %vm432_vm1, %v665_v26, 0.0  ;;  %s1823_s13 = sshll.u32 %s417_s17, 4  ;;  %s785_s21 = scalar_lea.sflag [#allocation4], %s1748_s25  ;;  %s1861_s13 = int_to_ptr.vmem [resolvable:$true] %s1823_s13 }
  0x9e   : > { %1209 = vset.pattern.permute.xlu1 %v1481_v13  ;;  %1207 = vset.pattern.permute.xlu0 %v1482_v14  ;;  %v674_v31 = vrot.slane %v673_v29, 4  ;;  %v556_v32 = vadd.f32 %v555_v28, %v554_v25  ;;  %v668_v25 = vld [vmem:[#allocation8 + $0x48] sm:$0xff]  ;;  %s1336_s16 = scalar_lea.vmem %s1815_s22, 128  ;;  %s1487_s23 = smov [#allocation10]  }
  0x9f   : > { %695 = vperm.xlu1 %1209, %v425_v3   ;;  %462 = vperm.xlu0 %1207, %v425_v3   ;;  %v435_v27 = vadd.f32 %v434_v24, %v433_v22  ;;  %v667_v24 = vld [vmem:[#allocation8 + $0x40] sm:$0xff]  ;;  %p1337_p4 = scmp.ne.s32.totalorder %s1815_s22, %s1336_s16  ;;  %s1340_s19 = sshll.u32 %s1487_s23, 4  ;;  %s1341_s19 = int_to_ptr.vmem [resolvable:$false] %s1340_s19 }
  0xa0   : > { %1105 = vmatpush3.bf16.msra.mxu0 %v1104_v9  ;;  %1111 = vmatpush3.bf16.msra.mxu1 %v1110_v18  ;;  %v675_v34 = vadd.f32 %v674_v31, %v673_v29  ;;  %v557_v35 = vrot.slane %v556_v32, 2  ;;  %v1113_v31 = vpack.c.bf16 %v668_v25, %v667_v24  ;;  %p2005_p9 = scmp.ne.s32.totalorder %s2003_s7, 0  ;;  %s1342_s8 = scalar_lea.vmem %s1341_s19, 256 }
  0xa1   : > { %1112 = vmatprep.subr.bf16.mxu0 %v1480_v2  ;;  %v436_v30 = vrot.slane %v435_v27, 2  ;;  %s1813_s12 = scalar_lea.hbm %s2004_s1, %s1806_s27  ;;  %p1343_p3 = scmp.lt.s32.totalorder %s1815_s22, %s1341_s19 }
  0xa2   : > { %v676_v37 = vrot.slane %v675_v34, 2  ;;  %v558_v38 = vadd.f32 %v557_v35, %v556_v32  ;;  %p1338_p12 = pnand %p1337_p4, %p2005_p9  ;;  %p1344_p5 = scmp.lt.s32.totalorder %s1342_s8, %s1336_s16 }
  0xa3   : > { %1210 = vset.pattern.permute.xlu1 %v1485_v19  ;;  %1211 = vset.pattern.permute.xlu0 %v1486_v20  ;;  %v437_v33 = vadd.f32 %v436_v30, %v435_v27 }
  0xa4   : > { %581 = vperm.xlu1 %1210, %v425_v3   ;;  %700 = vperm.xlu0 %1211, %v425_v3   ;;  %v677_v40 = vadd.f32 %v676_v37, %v675_v34  ;;  %v559_v41 = vrot.slane %v558_v38, 1  ;;  %v670_v34 = vld [vmem:[#allocation8 + $0x58] sm:$0xff]  ;;  %p1339_p6 = pneg %p1338_p12  ;;  %p1345_p7 = por %p1344_p5, %p1343_p3 }
  0xa5   : > { %v438_v36 = vrot.slane %v437_v33, 1 }
  0xa6   : > { %v678_v43 = vrot.slane %v677_v40, 1  ;;  %v560_v44 = vadd.f32 %v559_v41, %v558_v38  ;;  %p1346_p11 = pnand %p1345_p7, %p1339_p6 }
  0xa7   : > { %v439_v39 = vadd.f32 %v438_v36, %v437_v33  ;;  %v669_v33 = vld [vmem:[#allocation8 + $0x50] sm:$0xff] }
  0xa8   : > { %v679_v46 = vadd.f32 %v678_v43, %v677_v40  ;;  %v561_v47 = vmul.f32 0.125, %v560_v44  ;;  %v1116_v37 = vpack.c.bf16 %v670_v34, %v669_v33  ;;  %v1036_v43 = vld [vmem:[%s1950_s5] ss:$0 sm:$0xff] }
  0xa9   : > { %v441_v42 = vmul.f32 0.125, %v439_v39 }
  0xaa   : > { %v680_v49 = vmul.f32 0.125, %v679_v46  ;;  %v562_v50 = vsub.f32 %v546_v23, %v561_v47 }
  0xab   : > { %v442_v45 = vsub.f32 %v426_v21, %v441_v42 }
  0xac   : > { %v681_v52 = vsub.f32 %v665_v26, %v680_v49  ;;  %v563_v53 = vmul.f32 %v562_v50, %v562_v50 }
  0xad   : > { %v443_v48 = vmul.f32 %v442_v45, %v442_v45 }
  0xae   : > { %v682_v55 = vmul.f32 %v681_v52, %v681_v52  ;;  %v564_v56 = vsel %vm432_vm1, %v563_v53, 0.0 }
  0xaf   : > { %v444_v51 = vsel %vm432_vm1, %v443_v48, 0.0  ;;  %v565_v58 = vrot.slane %v564_v56, 4 }
  0xb0   : > { %v445_v54 = vrot.slane %v444_v51, 4  ;;  %v683_v59 = vsel %vm432_vm1, %v682_v55, 0.0 }
  0xb1   : > { %v684_v61 = vrot.slane %v683_v59, 4  ;;  %v566_v62 = vadd.f32 %v565_v58, %v564_v56 }
  0xb2   : > { %v446_v57 = vadd.f32 %v445_v54, %v444_v51 }
  0xb3   : > { %v685_v0 = vadd.f32 %v684_v61, %v683_v59  ;;  %v567_v1 = vrot.slane %v566_v62, 2 }
  0xb4   : > { %v447_v60 = vrot.slane %v446_v57, 2 }
  0xb5   : > { %v686_v4 = vrot.slane %v685_v0, 2  ;;  %v568_v5 = vadd.f32 %v567_v1, %v566_v62 }
  0xb6   : > { %v448_v63 = vadd.f32 %v447_v60, %v446_v57 }
  0xb7   : > { %v687_v7 = vadd.f32 %v686_v4, %v685_v0  ;;  %v569_v8 = vrot.slane %v568_v5, 1 }
  0xb8   : > { %v449_v3 = vrot.slane %v448_v63, 1 }
  0xb9   : > { %v688_v10 = vrot.slane %v687_v7, 1  ;;  %v570_v11 = vadd.f32 %v569_v8, %v568_v5 }
  0xba   : > { %v450_v6 = vadd.f32 %v449_v3, %v448_v63 }
  0xbb   : > { %v689_v13 = vadd.f32 %v688_v10, %v687_v7  ;;  %v571_v14 = vmul.f32 0.125, %v570_v11 }
  0xbc   : > { %v451_v9 = vmul.f32 0.125, %v450_v6 }
  0xbd   : > { %v690_v16 = vmul.f32 0.125, %v689_v13  ;;  %v572_v17 = vadd.f32 1e-06, %v571_v14 }
  0xbe   : > { %v452_v12 = vadd.f32 1e-06, %v451_v9 }
  0xbf   : > { %v691_v18 = vadd.f32 1e-06, %v690_v16 }
  0xc0   : > { %1212 = vrsqrt.f32 %v452_v12 }
  0xc1   : > { %1214 = vrsqrt.f32 %v572_v17 }
  0xc2   : > { %1216 = vrsqrt.f32 %v691_v18 }
  0xca   : > { %v1213_v19 = vpop.eup %1212 }
  0xcb   : > { %v454_v20 = vmul.f32 %v1213_v19, %v442_v45  ;;  %v1215_v23 = vpop.eup %1214  ;;  %v1039_v45 = vld [vmem:[%s1950_s5 + $0x1] ss:$0 sm:$0xff] }
  0xcc   : > { %v1217_v27 = vpop.eup %1216  ;;  %v574_v28 = vmul.f32 %v1215_v23, %v562_v50 }
  0xcd   : > { %v693_v35 = vmul.f32 %v1217_v27, %v681_v52 }
 0x119   : > { %v458_v21 = vpop.permute.xlu0 %457  ;;  %v577_v22 = vpop.permute.xlu1 %576 }
 0x11a   : > { %v460_v26 = vmul.f32 %v458_v21, %v454_v20  ;;  %v579_v36 = vmul.f32 %v577_v22, %v574_v28 }
 0x11e   : > { %v463_v29 = vpop.permute.xlu0 %462  ;;  %v696_v30 = vpop.permute.xlu1 %695 }
 0x11f   : > { %v465_v32 = vadd.f32 %v463_v29, %v460_v26  ;;  %v698_v41 = vmul.f32 %v696_v30, %v693_v35 }
 0x121   : > { %1076 = vmatmul.mubr.msk.f32.vlgmr.msra.gmra.mrb[0].mxu0 %vm432_vm1, %v465_v32 }
 0x122   : > { %1114 = vmatpush3.bf16.msra.mxu0 %v1113_v31  ;;  %1097 = vmatprep.mubr.msk.f32.mxu0 %vm1483_vm0, %v1484_v15 }
 0x123   : > { %v582_v38 = vpop.permute.xlu1 %581  ;;  %1115 = vmatprep.subr.bf16.mxu0 %v1480_v2  ;;  %v701_v40 = vpop.permute.xlu0 %700 }
 0x124   : > { %v584_v39 = vadd.f32 %v582_v38, %v579_v36  ;;  %v703_v42 = vadd.f32 %v701_v40, %v698_v41 }
 0x126   : > { %1117 = vmatpush3.bf16.msra.mxu0 %v1116_v37  ;;  %1087 = vmatmul.mubr.msk.f32.vlgmr.msra.gmra.mrb[0].mxu1 %vm432_vm1, %v584_v39 }
 0x129   : > { %1098 = vmatmul.mubr.msk.f32.vlgmr.msra.gmra.mrb[2].mxu0 %vm432_vm1, %v703_v42 }
 0x1f4   : > { %v541_v2 = vpop.f32.mrb[0].mxu0 }
 0x1f5   : > { %v542_v15 = vadd.f32 %v1036_v43, %v541_v2  ;;  %v1077_v44 = vpop.f32.mrb[1].mxu0 }
 0x1f7   : > { %545 = vst.msk [vmem:[%s410_s15] sm:$0xff] %vm432_vm1, %v542_v15 }
 0x1f8   : > { %1349 = shalt.err (!%p1346_p11)
}
 0x1f9   : > { %s1350_s25 = scalar_lea.hbm %s1813_s12, 128  ;;  %s1354_s20 = scalar_lea.hbm %s2004_s1, 256 }
 0x1fa   : > { %p1351_p0 = scmp.ne.s32.totalorder %s1813_s12, %s1350_s25  ;;  %p1355_p8 = scmp.lt.u32.totalorder %s1813_s12, %s2004_s1 }
 0x1fb   : > { %p1356_p1 = scmp.lt.u32.totalorder %s1354_s20, %s1350_s25  ;;  %p1358_p4 = scmp.lt.u32.totalorder %s1350_s25, %s1813_s12 }
 0x1fc   : > { %p1352_p13 = pnand %p1351_p0, %p2005_p9 }
 0x1fd   : > { %p1357_p2 = por %p1356_p1, %p1355_p8 }
 0x1fe   : > { %p1353_p10 = pneg %p1352_p13 }
 0x1ff   : > { %p1359_p12 = por %p1358_p4, %p1357_p2 }
 0x201   : > { %p1360_p6 = pnand %p1359_p12, %p1353_p10 }
 0x203   : > { %1363 = shalt.err (!%p1360_p6)
}
 0x204   : > { %1128 = dma.vmem_to_hbm [thread:$0]  (%p2005_p9), %s1815_s22, 128, %s1813_s12, %s785_s21   ;;  %v660_v46 = vpop.f32.mrb[0].mxu1  ;;  %v1042_v49 = vld [vmem:[%s1950_s5 + $0x2] ss:$0 sm:$0xff]  ;;  %v779_v50 = vpop.f32.mrb[2].mxu0 }
 0x205   : > { %s424_s10 = scalar_lea.vmem [#allocation13], %s1751_s9  ;;  %v661_v47 = vadd.f32 %v1039_v45, %v660_v46  ;;  %v1088_v48 = vpop.f32.mrb[1].mxu1  ;;  %s2006_s8 = sld [smem:[#allocation27_spill]]  ;;  %v780_v51 = vadd.f32 %v1042_v49, %v779_v50  ;;  %v1099_v52 = vpop.f32.mrb[3].mxu0 }
 0x206   : > { %s834_s14 = sshll.u32 %s424_s10, 4  ;;  %s2007_s21 = sld [smem:[#allocation28_spill]]  ;;  %s1872_s14 = int_to_ptr.vmem [resolvable:$true] %s834_s14 }
 0x207   : > { %664 = vst.msk [vmem:[%s417_s17] sm:$0xff] %vm432_vm1, %v661_v47  ;;  %s1876_s6 = scalar_lea.sflag [#allocation12], %s355_s30  ;;  %s1364_s20 = scalar_lea.vmem %s1861_s13, 128 }
 0x208   : > { %p1365_p3 = scmp.ne.s32.totalorder %s1861_s13, %s1364_s20  ;;  %s1488_s15 = smov [#allocation11]  }
 0x209   : > { %s1368_s26 = sshll.u32 %s1488_s15, 4  ;;  %s1369_s26 = int_to_ptr.vmem [resolvable:$false] %s1368_s26 }
 0x20a   : > { %p1366_p5 = pnand %p1365_p3, %p2005_p9  ;;  %s1370_s17 = scalar_lea.vmem %s1369_s26, 256 }
 0x20b   : > { %s1858_s25 = scalar_lea.hbm %s2006_s8, %s1806_s27  ;;  %p1371_p11 = scmp.lt.s32.totalorder %s1861_s13, %s1369_s26 }
 0x20c   : > { %s1870_s18 = scalar_lea.hbm %s2007_s21, %s1806_s27  ;;  %p1367_p7 = pneg %p1366_p5 }
 0x20d   : > { %p1372_p0 = scmp.lt.s32.totalorder %s1370_s17, %s1364_s20 }
 0x20f   : > { %p1373_p13 = por %p1372_p0, %p1371_p11 }
 0x211   : > { %p1374_p10 = pnand %p1373_p13, %p1367_p7 }
 0x213   : > { %1377 = shalt.err (!%p1374_p10)
}
 0x214   : > { %s1378_s24 = scalar_lea.hbm %s1858_s25, 128  ;;  %s1382_s11 = scalar_lea.hbm %s2006_s8, 256 }
 0x215   : > { %p1379_p8 = scmp.ne.s32.totalorder %s1858_s25, %s1378_s24  ;;  %p1383_p4 = scmp.lt.u32.totalorder %s1858_s25, %s2006_s8 }
 0x216   : > { %p1384_p12 = scmp.lt.u32.totalorder %s1382_s11, %s1378_s24  ;;  %p1386_p3 = scmp.lt.u32.totalorder %s1378_s24, %s1858_s25 }
 0x217   : > { %p1380_p1 = pnand %p1379_p8, %p2005_p9 }
 0x218   : > { %p1385_p6 = por %p1384_p12, %p1383_p4 }
 0x219   : > { %p1381_p2 = pneg %p1380_p1 }
 0x21a   : > { %p1387_p5 = por %p1386_p3, %p1385_p6 }
 0x21c   : > { %p1388_p7 = pnand %p1387_p5, %p1381_p2 }
 0x21e   : > { %1391 = shalt.err (!%p1388_p7)
}
 0x21f   : > { %1129 = dma.vmem_to_hbm [thread:$0]  (%p2005_p9), %s1861_s13, 128, %s1858_s25, %s1876_s6   ;;  %783 = vst.msk [vmem:[%s424_s10] sm:$0xff] %vm432_vm1, %v780_v51 }
 0x220   : > { %s1392_s19 = scalar_lea.vmem %s1872_s14, 128  ;;  %s1489_s22 = smov [#allocation13]  }
 0x221   : > { %p1393_p11 = scmp.ne.s32.totalorder %s1872_s14, %s1392_s19  ;;  %s1396_s12 = sshll.u32 %s1489_s22, 4  ;;  %s1397_s12 = int_to_ptr.vmem [resolvable:$false] %s1396_s12 }
 0x222   : > { %s1398_s20 = scalar_lea.vmem %s1397_s12, 256  ;;  %p1399_p10 = scmp.lt.s32.totalorder %s1872_s14, %s1397_s12 }
 0x223   : > { %p1394_p0 = pnand %p1393_p11, %p2005_p9  ;;  %p1400_p8 = scmp.lt.s32.totalorder %s1398_s20, %s1392_s19 }
 0x225   : > { %p1395_p13 = pneg %p1394_p0  ;;  %p1401_p1 = por %p1400_p8, %p1399_p10 }
 0x227   : > { %p1402_p2 = pnand %p1401_p1, %p1395_p13 }
 0x229   : > { %1405 = shalt.err (!%p1402_p2)
}
 0x22a   : > { %s1406_s9 = scalar_lea.hbm %s1870_s18, 128  ;;  %s1410_s25 = scalar_lea.hbm %s2007_s21, 256 }
 0x22b   : > { %p1407_p4 = scmp.ne.s32.totalorder %s1870_s18, %s1406_s9  ;;  %p1411_p3 = scmp.lt.u32.totalorder %s1870_s18, %s2007_s21 }
 0x22c   : > { %p1412_p5 = scmp.lt.u32.totalorder %s1410_s25, %s1406_s9  ;;  %p1414_p11 = scmp.lt.u32.totalorder %s1406_s9, %s1870_s18 }
 0x22d   : > { %p1408_p12 = pnand %p1407_p4, %p2005_p9 }
 0x22e   : > { %p1413_p7 = por %p1412_p5, %p1411_p3 }
 0x22f   : > { %p1409_p6 = pneg %p1408_p12 }
 0x230   : > { %p1415_p0 = por %p1414_p11, %p1413_p7 }
 0x232   : > { %p1416_p13 = pnand %p1415_p0, %p1409_p6 }
 0x234   : > { %1419 = shalt.err (!%p1416_p13)
}
 0x235   : > { %1130 = dma.vmem_to_hbm [thread:$0]  (%p2005_p9), %s1872_s14, 128, %s1870_s18, %s1876_s6  }
 0x236 PF: > { %s2008_s17 = sld [smem:[#allocation19_spill]]  ;;  %s2009_s24 = sld [smem:[#allocation24_spill]] }
 0x237   : > { %s2010_s30 = sld [smem:[#allocation20_spill]] }
 0x23c   : > { %s846_s27 = sand.u32 1, %s2008_s17   ;;  %p2011_p10 = scmp.ne.s32.totalorder %s2009_s24, 0 }
 0x23d   : > { %p2012_p8 = scmp.ge.s32.totalorder %s2010_s30, 2  ;;  %s847_s11 = scalar_lea.sflag [#allocation4], %s846_s27 }
 0x23f   : > { %p1149_p1 = pnand %p2012_p8, %p2011_p10 }
 0x241   : > { %1449 = dma.done.wait (!%p1149_p1), %s847_s11, 128  }
 0x242   : > { %1451 = vsyncadd (!%p1149_p1), %s847_s11, 4294967168  ;;  %s2013_s16 = sadd.s32 4294967294, %s2010_s30  }
 0x243   : > { %s855_s23 = sand.u32 1, %s2013_s16  }
 0x244   : > { %s856_s19 = scalar_lea.sflag [#allocation12], %s855_s23 }
 0x245   : > { %1453 = dma.done.wait (!%p1149_p1), %s856_s19, 256  }
 0x246   : > { %1455 = vsyncadd (!%p1149_p1), %s856_s19, 4294967040  ;;  %s2014_s30 = sld [smem:[#allocation21_spill]]  ;;  %s2015_s7 = sld [smem:[#allocation22_spill]] }
 0x247   : > { %s2016_s27 = smov %s1462_s28  ;;  %s2017_s28 = smov %s1466_s29 }
 0x24c   : > { %p29_p9 = scmp.ge.s32.totalorder %s2014_s30, 4   ;;  %s2018_s29 = smov %s2015_s7 }
 0x24e   :  { %31 = sbr.rel (!%p29_p9) target bundleno = 15 (0xf), region = 153 }
 0x255   :  { %870 = vsyncpa [#allocation3], 1 }
 0x256   :  { %872 = vsyncpa [#allocation3 + $0x1], 1 }
 0x257   :  { %873 = vsyncpa [#allocation6], 1 }
 0x258   :  { %875 = vsyncpa [#allocation6 + $0x1], 1 }
 0x259   :  { %876 = vsyncpa [#allocation9], 1 }
 0x25a   :  { %877 = vsyncpa [#allocation4], 1 }
 0x25b   :  { %879 = vsyncpa [#allocation4 + $0x1], 1 }
 0x25c   :  { %880 = vsyncpa [#allocation12], 1 }
 0x25d   :  { %882 = vsyncpa [#allocation12 + $0x1], 1 }

</bundles_post_ra>
